<compile_context>
chip_gen: v7x
topology: tpu7x:2x2x1
jax: 0.10.0
libtpu: 0.0.40
codegen_flags: <defaults>
</compile_context>

<pallas_src>
import jax
import jax.numpy as jnp
from jax.experimental import pallas as pl
from jax.experimental.pallas import tpu as pltpu

# Small synthetic sizes consistent with the forward semantics.
B = 2      # batch
S = 8      # text encoder sequence length
D = 32     # cross-attention dim
CLIP = 32  # CLIP image embedding dim
T = 4      # number of extra image-context (IP) tokens
TD = T * D
EPS = 1e-5


def ip_tokens_kernel(x_ref, w_ref, b_ref, g_ref, beta_ref, seg_ref, out_ref):
    """Single-step fused Linear + per-token LayerNorm, fully lane-dense.

    x_ref   : (BP, CLIP)   bf16  padded image_embeds
    w_ref   : (CLIP, T*D)  bf16  Linear weight, output lanes = fused (token, feature)
    b_ref   : (1, T*D)     f32   Linear bias
    g_ref   : (1, T*D)     f32   LayerNorm gamma, tiled per token
    beta_ref: (1, T*D)     f32   LayerNorm beta, tiled per token
    seg_ref : (T*D, T*D)   f32   block-diagonal averaging matrix (1/D within a token)
    out_ref : (BP, T*D)    encoder_hidden_states.dtype
    """
    x = x_ref[...]                                    # (BP, CLIP) bf16
    w = w_ref[...]                                    # (CLIP, TD) bf16

    # bf16 x bf16 -> f32 accumulation on the MXU; result already lane-laid-out as T*D.
    proj = jnp.dot(x, w, preferred_element_type=jnp.float32) + b_ref[...]  # (BP, TD) f32

    # Per-token LayerNorm without splitting lanes: segment means/vars via a constant
    # block-diagonal averaging matrix.  HIGHEST precision keeps the f32 stats exact.
    seg = seg_ref[...]
    mu = jnp.dot(proj, seg, preferred_element_type=jnp.float32,
                 precision=jax.lax.Precision.HIGHEST)                       # (BP, TD)
    c = proj - mu
    var = jnp.dot(c * c, seg, preferred_element_type=jnp.float32,
                  precision=jax.lax.Precision.HIGHEST)                      # (BP, TD)
    tok = c * jax.lax.rsqrt(var + EPS)
    out_ref[...] = (tok * g_ref[...] + beta_ref[...]).astype(out_ref.dtype)


def ip_adapter_forward(image_embeds, encoder_hidden_states, params):
    """ip_tokens = ImageProjModel(image_embeds); return cat([ehs, ip_tokens], dim=1)."""
    w_flat, b_flat, g_flat, beta_flat, seg = params
    b = image_embeds.shape[0]
    bp = max(8, ((b + 7) // 8) * 8)                   # pad batch to sublane granularity

    x = jnp.pad(image_embeds.astype(jnp.bfloat16), ((0, bp - b), (0, 0)))
    out_dtype = encoder_hidden_states.dtype

    tok_flat = pl.pallas_call(
        ip_tokens_kernel,
        out_shape=jax.ShapeDtypeStruct((bp, TD), out_dtype),
        grid_spec=pltpu.PrefetchScalarGridSpec(
            num_scalar_prefetch=0,
            grid=(1,),                                # single step at toy dims
            in_specs=[
                pl.BlockSpec((bp, CLIP), lambda i: (0, 0)),   # image embeds
                pl.BlockSpec((CLIP, TD), lambda i: (0, 0)),   # Linear weight
                pl.BlockSpec((1, TD), lambda i: (0, 0)),      # Linear bias
                pl.BlockSpec((1, TD), lambda i: (0, 0)),      # gamma (tiled)
                pl.BlockSpec((1, TD), lambda i: (0, 0)),      # beta  (tiled)
                pl.BlockSpec((TD, TD), lambda i: (0, 0)),     # segment-average matrix
            ],
            out_specs=pl.BlockSpec((bp, TD), lambda i: (0, 0)),
        ),
        # Single-step grid: megacore sharding is moot, so mark "arbitrary".
        compiler_params=pltpu.CompilerParams(dimension_semantics=("arbitrary",)),
    )(x, w_flat, b_flat, g_flat, beta_flat, seg)

    # Row-major (BP, T*D) -> (B, T, D) is a pure view reshape after the cheap row slice.
    ip_tokens = tok_flat[:b].reshape(b, T, D)

    # torch.cat([encoder_hidden_states, ip_tokens], dim=1) — kept in the wrapper so the
    # untouched text tokens never pass through the kernel.
    return jnp.concatenate([encoder_hidden_states, ip_tokens], axis=1)


def reference_forward(image_embeds, encoder_hidden_states, params):
    """Pure-JAX reference of the same semantics (same bf16 weight, f32 accumulation)."""
    w_flat, b_flat, g_flat, beta_flat, _ = params
    x = image_embeds.astype(jnp.bfloat16)
    proj = jnp.dot(x, w_flat, preferred_element_type=jnp.float32) + b_flat   # (B, TD)
    proj = proj.reshape(x.shape[0], T, D)
    mu = jnp.mean(proj, axis=-1, keepdims=True)
    var = jnp.mean((proj - mu) ** 2, axis=-1, keepdims=True)
    tok = (proj - mu) * jax.lax.rsqrt(var + EPS)
    tok = tok * g_flat.reshape(1, T, D) + beta_flat.reshape(1, T, D)
    return jnp.concatenate(
        [encoder_hidden_states, tok.astype(encoder_hidden_states.dtype)], axis=1
    )


if __name__ == "__main__":
    key = jax.random.PRNGKey(0)
    k_img, k_ehs, k_w, k_b, k_g, k_be = jax.random.split(key, 6)

    # ImageProjModel params.  Torch Linear weight is (T*D, CLIP); here built directly
    # in the transposed (CLIP, T*D) layout the kernel consumes, stored in bf16.
    w_flat = (jax.random.normal(k_w, (CLIP, TD), dtype=jnp.float32) * 0.02).astype(jnp.bfloat16)
    b_flat = (jax.random.normal(k_b, (TD,), dtype=jnp.float32) * 0.01).reshape(1, TD)
    gamma = 1.0 + 0.1 * jax.random.normal(k_g, (D,), dtype=jnp.float32)     # LN over D
    beta = 0.05 * jax.random.normal(k_be, (D,), dtype=jnp.float32)
    g_flat = jnp.tile(gamma, T).reshape(1, TD)
    beta_flat = jnp.tile(beta, T).reshape(1, TD)

    # Block-diagonal averaging matrix: seg[i, j] = 1/D if i, j belong to the same token.
    tok_id = jnp.arange(TD) // D
    seg = (tok_id[:, None] == tok_id[None, :]).astype(jnp.float32) / D      # (TD, TD)

    params = (w_flat, b_flat, g_flat, beta_flat, seg)

    # Inputs.
    image_embeds = jax.random.normal(k_img, (B, CLIP), dtype=jnp.float32)
    encoder_hidden_states = jax.random.normal(k_ehs, (B, S, D), dtype=jnp.float32)

    out = ip_adapter_forward(image_embeds, encoder_hidden_states, params)
    out = jax.block_until_ready(out)

    ref = reference_forward(image_embeds, encoder_hidden_states, params)
    assert out.shape == (B, S + T, D)
    assert jnp.allclose(out, ref, atol=5e-4, rtol=5e-4)

    print("KERNEL_OK")
</pallas_src>

<mosaic_0001>
module attributes {stable_mosaic.version = 11 : i64} {
  func.func @ip_tokens_kernel(%arg0: i32, %arg1: memref<8x32xbf16, #tpu.memory_space<vmem>>, %arg2: memref<32x128xbf16, #tpu.memory_space<vmem>>, %arg3: memref<1x128xf32, #tpu.memory_space<vmem>>, %arg4: memref<1x128xf32, #tpu.memory_space<vmem>>, %arg5: memref<1x128xf32, #tpu.memory_space<vmem>>, %arg6: memref<128x128xf32, #tpu.memory_space<vmem>>, %arg7: memref<8x128xf32, #tpu.memory_space<vmem>>) attributes {dimension_semantics = [#tpu.dimension_semantics<arbitrary>], iteration_bounds = array<i64: 1>, scalar_prefetch = 0 : i64, scratch_operands = 0 : i64, tpu.core_type = #tpu.core_type<tc>, window_params = [{pipeline_mode = #tpu.pipeline_mode<synchronous>, transform_indices = @transform_0, window_bounds = array<i64: 8, 32>}, {pipeline_mode = #tpu.pipeline_mode<synchronous>, transform_indices = @transform_1, window_bounds = array<i64: 32, 128>}, {pipeline_mode = #tpu.pipeline_mode<synchronous>, transform_indices = @transform_2, window_bounds = array<i64: 1, 128>}, {pipeline_mode = #tpu.pipeline_mode<synchronous>, transform_indices = @transform_3, window_bounds = array<i64: 1, 128>}, {pipeline_mode = #tpu.pipeline_mode<synchronous>, transform_indices = @transform_4, window_bounds = array<i64: 1, 128>}, {pipeline_mode = #tpu.pipeline_mode<synchronous>, transform_indices = @transform_5, window_bounds = array<i64: 128, 128>}, {pipeline_mode = #tpu.pipeline_mode<synchronous>, transform_indices = @transform_6, window_bounds = array<i64: 8, 128>}]} {
    %c0 = arith.constant 0 : index
    %c0_0 = arith.constant 0 : index
    %0 = vector.load %arg1[%c0, %c0_0] : memref<8x32xbf16, #tpu.memory_space<vmem>>, vector<8x32xbf16>
    %c0_1 = arith.constant 0 : index
    %c0_2 = arith.constant 0 : index
    %1 = vector.load %arg2[%c0_1, %c0_2] : memref<32x128xbf16, #tpu.memory_space<vmem>>, vector<32x128xbf16>
    %cst = arith.constant dense<0.000000e+00> : vector<8x128xf32>
    %2 = tpu.matmul %0, %1, %cst {dimension_numbers = #tpu.dot_dimension_numbers<[1], [0], [0], [1], [0, 0, 1, 1], [], []>} : vector<8x32xbf16>, vector<32x128xbf16>, vector<8x128xf32> -> vector<8x128xf32>
    %c0_3 = arith.constant 0 : index
    %c0_4 = arith.constant 0 : index
    %3 = vector.load %arg3[%c0_3, %c0_4] : memref<1x128xf32, #tpu.memory_space<vmem>>, vector<1x128xf32>
    %4 = vector.broadcast %3 : vector<1x128xf32> to vector<8x128xf32>
    %5 = arith.addf %2, %4 : vector<8x128xf32>
    %c0_5 = arith.constant 0 : index
    %c0_6 = arith.constant 0 : index
    %6 = vector.load %arg6[%c0_5, %c0_6] : memref<128x128xf32, #tpu.memory_space<vmem>>, vector<128x128xf32>
    %cst_7 = arith.constant dense<0.000000e+00> : vector<8x128xf32>
    %7 = tpu.matmul %5, %6, %cst_7 {dimension_numbers = #tpu.dot_dimension_numbers<[1], [0], [0], [1], [0, 0, 1, 1], [], []>, precision = #tpu.contract_precision<fp32>} : vector<8x128xf32>, vector<128x128xf32>, vector<8x128xf32> -> vector<8x128xf32>
    %8 = arith.subf %5, %7 : vector<8x128xf32>
    %9 = arith.mulf %8, %8 : vector<8x128xf32>
    %cst_8 = arith.constant dense<0.000000e+00> : vector<8x128xf32>
    %10 = tpu.matmul %9, %6, %cst_8 {dimension_numbers = #tpu.dot_dimension_numbers<[1], [0], [0], [1], [0, 0, 1, 1], [], []>, precision = #tpu.contract_precision<fp32>} : vector<8x128xf32>, vector<128x128xf32>, vector<8x128xf32> -> vector<8x128xf32>
    %cst_9 = arith.constant 9.99999974E-6 : f32
    %11 = vector.broadcast %cst_9 : f32 to vector<8x128xf32>
    %12 = arith.addf %10, %11 : vector<8x128xf32>
    %13 = math.rsqrt %12 : vector<8x128xf32>
    %14 = arith.mulf %8, %13 : vector<8x128xf32>
    %c0_10 = arith.constant 0 : index
    %c0_11 = arith.constant 0 : index
    %15 = vector.load %arg4[%c0_10, %c0_11] : memref<1x128xf32, #tpu.memory_space<vmem>>, vector<1x128xf32>
    %16 = vector.broadcast %15 : vector<1x128xf32> to vector<8x128xf32>
    %17 = arith.mulf %14, %16 : vector<8x128xf32>
    %c0_12 = arith.constant 0 : index
    %c0_13 = arith.constant 0 : index
    %18 = vector.load %arg5[%c0_12, %c0_13] : memref<1x128xf32, #tpu.memory_space<vmem>>, vector<1x128xf32>
    %19 = vector.broadcast %18 : vector<1x128xf32> to vector<8x128xf32>
    %20 = arith.addf %17, %19 : vector<8x128xf32>
    %c0_14 = arith.constant 0 : index
    %c0_15 = arith.constant 0 : index
    %21 = vector.load %arg7[%c0_14, %c0_15] : memref<8x128xf32, #tpu.memory_space<vmem>>, vector<8x128xf32>
    tpu.vector_store %arg7[%c0_14, %c0_15], %20 {strides = array<i32>} : memref<8x128xf32, #tpu.memory_space<vmem>>, vector<8x128xf32>,
    return
  }
  func.func @transform_0(%arg0: i32) -> (i32, i32) {
    %c0_i32 = arith.constant 0 : i32
    %c0_i32_0 = arith.constant 0 : i32
    %c0_i32_1 = arith.constant 0 : i32
    return %c0_i32, %c0_i32_0 : i32, i32
  }
  func.func @transform_1(%arg0: i32) -> (i32, i32) {
    %c0_i32 = arith.constant 0 : i32
    %c0_i32_0 = arith.constant 0 : i32
    %c0_i32_1 = arith.constant 0 : i32
    return %c0_i32, %c0_i32_0 : i32, i32
  }
  func.func @transform_2(%arg0: i32) -> (i32, i32) {
    %c0_i32 = arith.constant 0 : i32
    %c0_i32_0 = arith.constant 0 : i32
    %c0_i32_1 = arith.constant 0 : i32
    return %c0_i32, %c0_i32_0 : i32, i32
  }
  func.func @transform_3(%arg0: i32) -> (i32, i32) {
    %c0_i32 = arith.constant 0 : i32
    %c0_i32_0 = arith.constant 0 : i32
    %c0_i32_1 = arith.constant 0 : i32
    return %c0_i32, %c0_i32_0 : i32, i32
  }
  func.func @transform_4(%arg0: i32) -> (i32, i32) {
    %c0_i32 = arith.constant 0 : i32
    %c0_i32_0 = arith.constant 0 : i32
    %c0_i32_1 = arith.constant 0 : i32
    return %c0_i32, %c0_i32_0 : i32, i32
  }
  func.func @transform_5(%arg0: i32) -> (i32, i32) {
    %c0_i32 = arith.constant 0 : i32
    %c0_i32_0 = arith.constant 0 : i32
    %c0_i32_1 = arith.constant 0 : i32
    return %c0_i32, %c0_i32_0 : i32, i32
  }
  func.func @transform_6(%arg0: i32) -> (i32, i32) {
    %c0_i32 = arith.constant 0 : i32
    %c0_i32_0 = arith.constant 0 : i32
    %c0_i32_1 = arith.constant 0 : i32
    return %c0_i32, %c0_i32_0 : i32, i32
  }
}

</mosaic_0001>

<bundles_post_ra>
// kernel: tpu_custom_call.1
= control target key start
LH: loop header
LB: loop body
LE: loop exit
PB: predicated region body
PF: predicated region fallthrough
CT: control target
= control target key end

     0   :  { %11 = vsyncpa [#allocation3], 0  ;;  %s3168_s0 = inlined_call_operand.hbm [shape: bf16[8,32], index: 0, kind: input, shape index: {}]   ;;  %s3169_s1 = inlined_call_operand.hbm [shape: bf16[32,128], index: 1, kind: input, shape index: {}]   ;;  %s3170_s2 = inlined_call_operand.vmem [shape: f32[1,128], index: 2, kind: input, shape index: {}]   ;;  %s3171_s3 = inlined_call_operand.vmem [shape: f32[1,128], index: 3, kind: input, shape index: {}]   ;;  %s3172_s4 = inlined_call_operand.vmem [shape: f32[1,128], index: 4, kind: input, shape index: {}]   ;;  %s3173_s5 = inlined_call_operand.hbm [shape: f32[128,128], index: 5, kind: input, shape index: {}]   ;;  %s3174_s6 = inlined_call_operand.hbm [shape: f32[8,128], index: 6, kind: output, shape index: {}]  }
   0x1   :  { %12 = vsyncpa [#allocation6], 0 }
   0x2   :  { %13 = vsyncpa [#allocation4], 0  ;;  %s2526_s21 = smov [#allocation5]   ;;  %s2432_s25 = scalar_lea.hbm %s3169_s1, 256 }
   0x3   :  { %s29_s22 = sshll.u32 %s2526_s21, 4  ;;  %p2433_p0 = scmp.ne.s32.totalorder %s3169_s1, %s2432_s25  ;;  %s30_s22 = int_to_ptr.vmem [resolvable:$true] %s29_s22 }
   0x4   :  { %p2436_p1 = scmp.lt.u32.totalorder %s2432_s25, %s3169_s1 }
   0x6   :  { %p2438_p2 = pnand %p2436_p1, %p2433_p0 }
   0x8   :  { %2441 = shalt.err (!%p2438_p2)
}
   0x9   :  { %s2442_s30 = scalar_lea.vmem %s30_s22, 256  ;;  %p2447_p4 = scmp.lt.s32.totalorder %s30_s22, %s30_s22 }
   0xa   :  { %p2443_p3 = scmp.ne.s32.totalorder %s30_s22, %s2442_s30  ;;  %p2448_p5 = scmp.lt.s32.totalorder %s2442_s30, %s2442_s30 }
   0xc   :  { %p2449_p6 = por %p2448_p5, %p2447_p4 }
   0xe   :  { %p2450_p7 = pnand %p2449_p6, %p2443_p3 }
  0x10   :  { %2453 = shalt.err (!%p2450_p7)
}
  0x11   :  { %s2527_s7 = smov 64   ;;  %s2528_s8 = smov 4  }
  0x12   :  { %35 = dma.hbm_to_vmem [thread:$0]  %s3169_s1, 256, %s30_s22, [#allocation6], %s2527_s7, %s2527_s7, %s2528_s8  }
  0x13   :  { %s2529_s11 = smov [#allocation2]   ;;  %s2530_s13 = smov [#allocation7]  }
  0x14   :  { %s20_s12 = sshll.u32 %s2529_s11, 4  ;;  %s47_s14 = sshll.u32 %s2530_s13, 4  ;;  %s21_s12 = int_to_ptr.vmem [resolvable:$true] %s20_s12  ;;  %s48_s14 = int_to_ptr.vmem [resolvable:$true] %s47_s14 }
  0x15   :  { %s2454_s17 = scalar_lea.hbm %s3168_s0, 64 }
  0x16   :  { %p2455_p8 = scmp.ne.s32.totalorder %s3168_s0, %s2454_s17  ;;  %p2458_p9 = scmp.lt.u32.totalorder %s2454_s17, %s3168_s0 }
  0x18   :  { %p2460_p10 = pnand %p2458_p9, %p2455_p8 }
  0x1a   :  { %2463 = shalt.err (!%p2460_p10)
}
  0x1b   :  { %s2464_s1 = scalar_lea.vmem %s21_s12, 64  ;;  %p2469_p12 = scmp.lt.s32.totalorder %s21_s12, %s21_s12 }
  0x1c   :  { %p2465_p11 = scmp.ne.s32.totalorder %s21_s12, %s2464_s1  ;;  %p2470_p13 = scmp.lt.s32.totalorder %s2464_s1, %s2464_s1 }
  0x1e   :  { %p2471_p0 = por %p2470_p13, %p2469_p12 }
  0x20   :  { %p2472_p1 = pnand %p2471_p0, %p2465_p11 }
  0x22   :  { %2475 = shalt.err (!%p2472_p1)
}
  0x23   :  { %23 = dma.hbm_to_vmem [thread:$0]  %s3168_s0, 64, %s21_s12, [#allocation3]  }
  0x24   :  { %s2476_s26 = scalar_lea.hbm %s3173_s5, 2048 }
  0x25   :  { %p2477_p2 = scmp.ne.s32.totalorder %s3173_s5, %s2476_s26  ;;  %p2480_p3 = scmp.lt.u32.totalorder %s2476_s26, %s3173_s5 }
  0x27   :  { %p2482_p4 = pnand %p2480_p3, %p2477_p2 }
  0x29   :  { %2485 = shalt.err (!%p2482_p4)
}
  0x2a   :  { %s2486_s7 = scalar_lea.vmem %s48_s14, 2048  ;;  %p2491_p6 = scmp.lt.s32.totalorder %s48_s14, %s48_s14 }
  0x2b   :  { %p2487_p5 = scmp.ne.s32.totalorder %s48_s14, %s2486_s7  ;;  %p2492_p7 = scmp.lt.s32.totalorder %s2486_s7, %s2486_s7 }
  0x2d   :  { %p2493_p8 = por %p2492_p7, %p2491_p6 }
  0x2f   :  { %p2494_p9 = pnand %p2493_p8, %p2487_p5 }
  0x31   :  { %2497 = shalt.err (!%p2494_p9)
}
  0x32   :  { %s2531_s0 = smov 128   ;;  %s2532_s8 = smov 8  }
  0x33   :  { %53 = dma.hbm_to_vmem [thread:$0]  %s3173_s5, 2048, %s48_s14, [#allocation6], %s2531_s0, %s2531_s0, %s2532_s8  }
  0x34   :  { %2520 = dma.done.wait [#allocation3], 64  }
  0x35   :  { %2521 = vsyncadd [#allocation3], 4294967232 }
  0x36   :  { %2522 = dma.done.wait [#allocation6], 2304  }
  0x37   :  { %2523 = vsyncadd [#allocation6], 4294964992  ;;  %v2533_v0 = vmov 0.0   ;;  %vm2534_vm0 = vmmov 0   ;;  %v2535_v1 = vmov 0.0|0.0   ;;  %v2428_v2 = vld [vmem:[#allocation5] sm:$0xff]  }
  0x38   :  { %1680 = vmatprep.subr.bf16.mxu0 %v2533_v0  ;;  %1684 = vmatprep.mubr.msk.bf16.mxu0 %vm2534_vm0, %v2533_v0  ;;  %v2429_v3 = vld [vmem:[#allocation5 + $0x8] sm:$0xff]   ;;  %v2614_v4 = vld [vmem:[#allocation7] sm:$0xff]  ;;  %v2616_v5 = vld [vmem:[#allocation7 + $0x8] sm:$0xff]  ;;  %vm88_vm1 = vcmask 261120   ;;  %s2536_s15 = smov [#allocation8]  }
  0x39   :  { %2108 = vmatprep.subr.bf16.mxu1 %v2535_v1  ;;  %1720 = vmatprep.mubr.msk.f32.mxu1 %vm2534_vm0, %v2533_v0  ;;  %v149_v6 = vand.u32 4294901760, %v2614_v4  ;;  %v152_v7 = vand.u32 4294901760, %v2616_v5  ;;  %v2621_v8 = vld [vmem:[#allocation7 + $0x10] sm:$0xff]  ;;  %v2623_v9 = vld [vmem:[#allocation7 + $0x18] sm:$0xff]  ;;  %v2627_v12 = vld [vmem:[#allocation7 + $0x20] sm:$0xff]  ;;  %s1457_s16 = sshll.u32 %s2536_s15, 4  ;;  %s1458_s16 = int_to_ptr.vmem [resolvable:$true] %s1457_s16 }
  0x3a   :  { %1681 = vmatpush3.bf16.msra.mxu0 %v2428_v2  ;;  %v155_v10 = vand.u32 4294901760, %v2621_v8  ;;  %v158_v11 = vand.u32 4294901760, %v2623_v9  ;;  %v2629_v13 = vld [vmem:[#allocation7 + $0x28] sm:$0xff]  ;;  %v161_v17 = vand.u32 4294901760, %v2627_v12  ;;  %v2648_v19 = vld [vmem:[#allocation7 + $0x30] sm:$0xff]  ;;  %v2650_v20 = vld [vmem:[#allocation7 + $0x38] sm:$0xff]  ;;  %p2503_p11 = scmp.lt.s32.totalorder %s1458_s16, %s1458_s16 }
  0x3b   :  { %1682 = vmatprep.subr.bf16.mxu0 %v2533_v0  ;;  %v2635_v14 = vpack.c.bf16 %v152_v7, %v149_v6  ;;  %v64_v15 = vld [vmem:[#allocation2] sm:$0xf]  ;;  %v164_v18 = vand.u32 4294901760, %v2629_v13  ;;  %v167_v22 = vand.u32 4294901760, %v2648_v19  ;;  %v170_v23 = vand.u32 4294901760, %v2650_v20  ;;  %v2666_v24 = vld [vmem:[#allocation7 + $0x40] sm:$0xff] }
  0x3c   :  { %v2642_v16 = vpack.c.bf16 %v158_v11, %v155_v10  ;;  %v2668_v25 = vld [vmem:[#allocation7 + $0x48] sm:$0xff]  ;;  %v173_v27 = vand.u32 4294901760, %v2666_v24  ;;  %v142_v30 = vld [vmem:[#allocation7 + $0x50] sm:$0xff]  ;;  %v143_v31 = vld [vmem:[#allocation7 + $0x58] sm:$0xff]  ;;  %s2498_s17 = scalar_lea.vmem %s1458_s16, 128 }
  0x3d   :  { %2110 = vmatpush3.bf16.msra.mxu1 %v2635_v14  ;;  %v2660_v21 = vpack.c.bf16 %v164_v18, %v161_v17  ;;  %v2676_v26 = vpack.c.bf16 %v170_v23, %v167_v22  ;;  %v176_v28 = vand.u32 4294901760, %v2668_v25  ;;  %v179_v32 = vand.u32 4294901760, %v142_v30  ;;  %v144_v35 = vld [vmem:[#allocation7 + $0x60] sm:$0xff]  ;;  %v145_v36 = vld [vmem:[#allocation7 + $0x68] sm:$0xff]  ;;  %v146_v40 = vld [vmem:[#allocation7 + $0x70] sm:$0xff]  ;;  %p2499_p10 = scmp.ne.s32.totalorder %s1458_s16, %s2498_s17  ;;  %p2504_p12 = scmp.lt.s32.totalorder %s2498_s17, %s2498_s17 }
  0x3e   :  { %1683 = vmatpush3.bf16.msra.mxu0 %v2429_v3  ;;  %2111 = vmatprep.subr.bf16.mxu1 %v2535_v1  ;;  %v182_v33 = vand.u32 4294901760, %v143_v31  ;;  %v185_v37 = vand.u32 4294901760, %v144_v35  ;;  %v188_v38 = vand.u32 4294901760, %v145_v36  ;;  %v147_v41 = vld [vmem:[#allocation7 + $0x78] sm:$0xff]  ;;  %v191_v42 = vand.u32 4294901760, %v146_v40 }
  0x3f   :  { %2252 = vmatprep.subr.bf16.mxu0 %v2535_v1  ;;  %v2688_v29 = vpack.c.bf16 %v176_v28, %v173_v27  ;;  %v194_v43 = vand.u32 4294901760, %v147_v41  ;;  %v2716_v45 = vsub.f32 %v142_v30, %v179_v32  ;;  %p2505_p13 = por %p2504_p12, %p2503_p11 }
  0x40   :  { %v2698_v34 = vpack.c.bf16 %v182_v33, %v179_v32  ;;  %v2704_v39 = vpack.c.bf16 %v188_v38, %v185_v37  ;;  %v2718_v46 = vsub.f32 %v143_v31, %v182_v33  ;;  %v2728_v51 = vsub.f32 %v144_v35, %v185_v37 }
  0x41   :  { %1685 = vmatmul.mubr.msk.bf16.vlgmr.msra.gmra.mrb[0].mxu0 %vm88_vm1, %v64_v15  ;;  %2113 = vmatpush3.bf16.msra.mxu1 %v2642_v16  ;;  %v2710_v44 = vpack.c.bf16 %v194_v43, %v191_v42  ;;  %v312_v47 = vand.u32 4294901760, %v2716_v45  ;;  %v2730_v52 = vsub.f32 %v145_v36, %v188_v38  ;;  %v2739_v59 = vsub.f32 %v146_v40, %v191_v42  ;;  %p2506_p0 = pnand %p2505_p13, %p2499_p10 }
  0x42   :  { %2254 = vmatpush3.bf16.msra.mxu0 %v2635_v14  ;;  %1930 = vmatprep.mubr.msk.f32.mxu0 %vm2534_vm0, %v2533_v0  ;;  %v319_v48 = vand.u32 4294901760, %v2718_v46  ;;  %v326_v55 = vand.u32 4294901760, %v2728_v51  ;;  %v2741_v60 = vsub.f32 %v147_v41, %v194_v43  ;;  %v2760_v36 = vpack.c.bf16 %v2718_v46, %v2716_v45 }
  0x43   :  { %2255 = vmatprep.subr.bf16.mxu0 %v2535_v1  ;;  %2114 = vmatprep.subr.bf16.mxu1 %v2535_v1  ;;  %v313_v49 = vsub.f32 %v2716_v45, %v312_v47  ;;  %v333_v56 = vand.u32 4294901760, %v2730_v52  ;;  %v340_v63 = vand.u32 4294901760, %v2739_v59  ;;  %v2764_v37 = vpack.c.bf16 %v2730_v52, %v2728_v51 }
  0x44   :  { %v320_v50 = vsub.f32 %v2718_v46, %v319_v48  ;;  %v327_v58 = vsub.f32 %v2728_v51, %v326_v55  ;;  %v3175_v2 = vand.u32 4294901760, %v2741_v60  ;;  %v2768_v38 = vpack.c.bf16 %v2741_v60, %v2739_v59 }
  0x45   :  { %2116 = vmatpush3.bf16.msra.mxu1 %v2660_v21  ;;  %v314_v53 = vand.u32 4294901760, %v313_v49  ;;  %v334_v61 = vsub.f32 %v2730_v52, %v333_v56  ;;  %v341_v15 = vsub.f32 %v2739_v59, %v340_v63  ;;  %v2773_v40 = vsub.f32 %v2614_v4, %v149_v6  ;;  %v1467_v4 = vld [vmem:[%s3170_s2] ss:$0 sm:$0xff] }
  0x46   :  { %2257 = vmatpush3.bf16.msra.mxu0 %v2642_v16  ;;  %2117 = vmatprep.subr.bf16.mxu1 %v2535_v1  ;;  %v321_v54 = vand.u32 4294901760, %v320_v50  ;;  %v328_v62 = vand.u32 4294901760, %v327_v58  ;;  %v348_v30 = vsub.f32 %v2741_v60, %v3175_v2  ;;  %v2778_v41 = vsub.f32 %v2616_v5, %v152_v7 }
  0x47   :  { %2258 = vmatprep.subr.bf16.mxu0 %v2535_v1  ;;  %v335_v3 = vand.u32 4294901760, %v334_v61  ;;  %v342_v32 = vand.u32 4294901760, %v341_v15  ;;  %v242_v42 = vand.u32 4294901760, %v2773_v40  ;;  %v2785_v49 = vsub.f32 %v2621_v8, %v155_v10 }
  0x48   :  { %v2734_v57 = vpack.c.bf16 %v321_v54, %v314_v53  ;;  %v349_v33 = vand.u32 4294901760, %v348_v30  ;;  %v249_v43 = vand.u32 4294901760, %v2778_v41  ;;  %v2790_v50 = vsub.f32 %v2623_v9, %v158_v11 }
  0x49   :  { %2119 = vmatpush3.bf16.msra.mxu1 %v2676_v26  ;;  %v2754_v31 = vpack.c.bf16 %v335_v3, %v328_v62  ;;  %v243_v6 = vsub.f32 %v2773_v40, %v242_v42  ;;  %v256_v8 = vand.u32 4294901760, %v2785_v49  ;;  %v2808_v11 = vsub.f32 %v2627_v12, %v161_v17 }
  0x4a   :  { %2260 = vmatpush3.bf16.msra.mxu0 %v2660_v21  ;;  %2120 = vmatprep.subr.bf16.mxu1 %v2535_v1  ;;  %v2756_v35 = vpack.c.bf16 %v349_v33, %v342_v32  ;;  %v250_v7 = vsub.f32 %v2778_v41, %v249_v43  ;;  %v263_v9 = vand.u32 4294901760, %v2790_v50  ;;  %v2813_v54 = vsub.f32 %v2629_v13, %v164_v18 }
  0x4b   :  { %2261 = vmatprep.subr.bf16.mxu0 %v2535_v1  ;;  %v244_v3 = vand.u32 4294901760, %v243_v6  ;;  %v257_v30 = vsub.f32 %v2785_v49, %v256_v8  ;;  %v270_v17 = vand.u32 4294901760, %v2808_v11  ;;  %v2833_v32 = vsub.f32 %v2648_v19, %v167_v22 }
  0x4c   :  { %v251_v15 = vand.u32 4294901760, %v250_v7  ;;  %v264_v13 = vsub.f32 %v2790_v50, %v263_v9  ;;  %v277_v18 = vand.u32 4294901760, %v2813_v54  ;;  %v2838_v33 = vsub.f32 %v2650_v20, %v170_v23 }
  0x4d   :  { %2122 = vmatpush3.bf16.msra.mxu1 %v2688_v29  ;;  %v258_v6 = vand.u32 4294901760, %v257_v30  ;;  %v271_v19 = vsub.f32 %v2808_v11, %v270_v17  ;;  %v284_v20 = vand.u32 4294901760, %v2833_v32  ;;  %v3176_v45 = vand.u32 4294901760, %v2741_v60 }
  0x4e   :  { %2263 = vmatpush3.bf16.msra.mxu0 %v2676_v26  ;;  %2123 = vmatprep.subr.bf16.mxu1 %v2535_v1  ;;  %v278_v22 = vsub.f32 %v2813_v54, %v277_v18  ;;  %v291_v23 = vand.u32 4294901760, %v2838_v33 }
  0x4f   :  { %2264 = vmatprep.subr.bf16.mxu0 %v2535_v1  ;;  %v272_v30 = vand.u32 4294901760, %v271_v19  ;;  %v285_v2 = vsub.f32 %v2833_v32, %v284_v20  ;;  %v3025_v46 = vpack.c.bf16 %v3176_v45, %v340_v63 }
  0x51   :  { %2125 = vmatpush3.bf16.msra.mxu1 %v2698_v34 }
  0x52   :  { %2266 = vmatpush3.bf16.msra.mxu0 %v2688_v29  ;;  %2126 = vmatprep.subr.bf16.mxu1 %v2535_v1 }
  0x53   :  { %2267 = vmatprep.subr.bf16.mxu0 %v2535_v1 }
  0x55   :  { %2128 = vmatpush3.bf16.msra.mxu1 %v2704_v39 }
  0x56   :  { %2269 = vmatpush3.bf16.msra.mxu0 %v2698_v34  ;;  %2129 = vmatprep.subr.bf16.mxu1 %v2535_v1 }
  0x57   :  { %2270 = vmatprep.subr.bf16.mxu0 %v2535_v1 }
  0x59   :  { %2131 = vmatpush3.bf16.msra.mxu1 %v2710_v44 }
  0x5a   :  { %2272 = vmatpush3.bf16.msra.mxu0 %v2704_v39  ;;  %2132 = vmatprep.subr.bf16.mxu1 %v2535_v1 }
  0x5b   :  { %2273 = vmatprep.subr.bf16.mxu0 %v2535_v1 }
  0x5e   :  { %2275 = vmatpush3.bf16.msra.mxu0 %v2710_v44 }
  0x5f   :  { %2276 = vmatprep.subr.bf16.mxu0 %v2535_v1 }
 0x114   :  { %v126_v5 = vpop.f32.mrb[0].mxu0 }
 0x115   :  { %v2802_v10 = vadd.f32 %v1467_v4, %v126_v5  ;;  %v1686_v53 = vpop.f32.mrb[1].mxu0  ;;  %v2841_v5 = vpack.c.bf16 %v251_v15, %v244_v3 }
 0x116   :  { %v129_v58 = vpop.f32.mrb[2].mxu0  ;;  %v265_v53 = vand.u32 4294901760, %v264_v13  ;;  %v279_v13 = vand.u32 4294901760, %v278_v22 }
 0x117   :  { %v2816_v61 = vand.u32 4294901760, %v2802_v10  ;;  %v1687_v62 = vpop.f32.mrb[3].mxu0  ;;  %v2857_v58 = vsub.f32 %v2666_v24, %v173_v27  ;;  %v292_v24 = vsub.f32 %v2838_v33, %v291_v23 }
 0x118   :  { %v2862_v62 = vsub.f32 %v2668_v25, %v176_v28  ;;  %v2864_v15 = vpack.c.bf16 %v265_v53, %v258_v6  ;;  %v2878_v28 = vpack.c.bf16 %v279_v13, %v272_v30  ;;  %v286_v6 = vand.u32 4294901760, %v285_v2 }
 0x119   :  { %v2823_v12 = vsub.f32 %v2802_v10, %v2816_v61  ;;  %v298_v27 = vand.u32 4294901760, %v2857_v58  ;;  %v2905_v13 = vpack.c.bf16 %v2778_v41, %v2773_v40  ;;  %v2985_v40 = vpack.c.bf16 %v277_v18, %v270_v17 }
 0x11a   :  { %v305_v25 = vand.u32 4294901760, %v2862_v62  ;;  %v2993_v41 = vpack.c.bf16 %v291_v23, %v284_v20 }
 0x11b   :  { %v231_v4 = vand.u32 4294901760, %v2823_v12  ;;  %v299_v53 = vsub.f32 %v2857_v58, %v298_v27 }
 0x11c   :  { %v306_v19 = vsub.f32 %v2862_v62, %v305_v25 }
 0x11d   :  { %v232_v7 = vsub.f32 %v2823_v12, %v231_v4 }
 0x11e   :  { %v307_v30 = vand.u32 4294901760, %v306_v19  ;;  %v2965_v19 = vpack.c.bf16 %v249_v43, %v242_v42  ;;  %v3001_v42 = vpack.c.bf16 %v305_v25, %v298_v27  ;;  %v3009_v43 = vpack.c.bf16 %v319_v48, %v312_v47 }
 0x11f   :  { %v233_v3 = vand.u32 4294901760, %v232_v7  ;;  %v293_v7 = vand.u32 4294901760, %v292_v24  ;;  %v2912_v24 = vpack.c.bf16 %v2790_v50, %v2785_v49  ;;  %v3017_v49 = vpack.c.bf16 %v333_v56, %v326_v55 }
 0x121   :  { %1721 = vmatmul.mubr.f32.vlgmr.msra.gmra.mrb[0].mxu1 %v233_v3  ;;  %v2889_v22 = vpack.c.bf16 %v293_v7, %v286_v6  ;;  %v300_v3 = vand.u32 4294901760, %v299_v53  ;;  %v2920_v6 = vpack.c.bf16 %v2813_v54, %v2808_v11  ;;  %v2926_v7 = vpack.c.bf16 %v2838_v33, %v2833_v32 }
 0x122   :  { %2134 = vmatpush3.bf16.msra.mxu1 %v2841_v5  ;;  %1755 = vmatprep.mubr.msk.f32.mxu1 %vm2534_vm0, %v2533_v0  ;;  %v2932_v53 = vpack.c.bf16 %v2862_v62, %v2857_v58 }
 0x123   :  { %2135 = vmatprep.subr.bf16.mxu1 %v2535_v1  ;;  %v2893_v2 = vpack.c.bf16 %v307_v30, %v300_v3  ;;  %v2975_v3 = vpack.c.bf16 %v263_v9, %v256_v8 }
 0x126   :  { %2137 = vmatpush3.bf16.msra.mxu1 %v2864_v15 }
 0x127   :  { %2138 = vmatprep.subr.bf16.mxu1 %v2535_v1 }
 0x12a   :  { %2140 = vmatpush3.bf16.msra.mxu1 %v2878_v28 }
 0x12b   :  { %2141 = vmatprep.subr.bf16.mxu1 %v2535_v1 }
 0x12e   :  { %2143 = vmatpush3.bf16.msra.mxu1 %v2889_v22 }
 0x12f   :  { %2144 = vmatprep.subr.bf16.mxu1 %v2535_v1 }
 0x132   :  { %2146 = vmatpush3.bf16.msra.mxu1 %v2893_v2 }
 0x133   :  { %2147 = vmatprep.subr.bf16.mxu1 %v2535_v1 }
 0x136   :  { %2149 = vmatpush3.bf16.msra.mxu1 %v2734_v57 }
 0x137   :  { %2150 = vmatprep.subr.bf16.mxu1 %v2535_v1 }
 0x13a   :  { %2152 = vmatpush3.bf16.msra.mxu1 %v2754_v31 }
 0x13b   :  { %2153 = vmatprep.subr.bf16.mxu1 %v2535_v1 }
 0x13e   :  { %2155 = vmatpush3.bf16.msra.mxu1 %v2756_v35 }
 0x13f   :  { %2156 = vmatprep.subr.bf16.mxu1 %v2535_v1 }
 0x141   :  { %1756 = vmatmul.mubr.f32.vlgmr.msra.gmra.mrb[0].mxu1 %v2816_v61 }
 0x142   :  { %2158 = vmatpush3.bf16.msra.mxu1 %v2905_v13  ;;  %1790 = vmatprep.mubr.msk.f32.mxu1 %vm2534_vm0, %v2533_v0 }
 0x143   :  { %2159 = vmatprep.subr.bf16.mxu1 %v2535_v1 }
 0x146   :  { %2161 = vmatpush3.bf16.msra.mxu1 %v2912_v24 }
 0x147   :  { %2162 = vmatprep.subr.bf16.mxu1 %v2535_v1 }
 0x14a   :  { %2164 = vmatpush3.bf16.msra.mxu1 %v2920_v6 }
 0x14b   :  { %2165 = vmatprep.subr.bf16.mxu1 %v2535_v1 }
 0x14e   :  { %2167 = vmatpush3.bf16.msra.mxu1 %v2926_v7 }
 0x14f   :  { %2168 = vmatprep.subr.bf16.mxu1 %v2535_v1 }
 0x152   :  { %2170 = vmatpush3.bf16.msra.mxu1 %v2932_v53 }
 0x153   :  { %2171 = vmatprep.subr.bf16.mxu1 %v2535_v1 }
 0x156   :  { %2173 = vmatpush3.bf16.msra.mxu1 %v2760_v36 }
 0x157   :  { %2174 = vmatprep.subr.bf16.mxu1 %v2535_v1 }
 0x15a   :  { %2176 = vmatpush3.bf16.msra.mxu1 %v2764_v37 }
 0x15b   :  { %2177 = vmatprep.subr.bf16.mxu1 %v2535_v1 }
 0x15e   :  { %2179 = vmatpush3.bf16.msra.mxu1 %v2768_v38 }
 0x15f   :  { %2180 = vmatprep.subr.bf16.mxu1 %v2535_v1 }
 0x161   :  { %1791 = vmatmul.mubr.f32.vlgmr.msra.gmra.mrb[0].mxu1 %v2823_v12 }
 0x162   :  { %2182 = vmatpush3.bf16.msra.mxu1 %v2635_v14  ;;  %1825 = vmatprep.mubr.msk.f32.mxu1 %vm2534_vm0, %v2533_v0 }
 0x163   :  { %2183 = vmatprep.subr.bf16.mxu1 %v2535_v1 }
 0x166   :  { %2185 = vmatpush3.bf16.msra.mxu1 %v2642_v16 }
 0x167   :  { %2186 = vmatprep.subr.bf16.mxu1 %v2535_v1 }
 0x16a   :  { %2188 = vmatpush3.bf16.msra.mxu1 %v2660_v21 }
 0x16b   :  { %2189 = vmatprep.subr.bf16.mxu1 %v2535_v1 }
 0x16e   :  { %2191 = vmatpush3.bf16.msra.mxu1 %v2676_v26 }
 0x16f   :  { %2192 = vmatprep.subr.bf16.mxu1 %v2535_v1 }
 0x172   :  { %2194 = vmatpush3.bf16.msra.mxu1 %v2688_v29 }
 0x173   :  { %2195 = vmatprep.subr.bf16.mxu1 %v2535_v1 }
 0x176   :  { %2197 = vmatpush3.bf16.msra.mxu1 %v2698_v34 }
 0x177   :  { %2198 = vmatprep.subr.bf16.mxu1 %v2535_v1 }
 0x17a   :  { %2200 = vmatpush3.bf16.msra.mxu1 %v2704_v39 }
 0x17b   :  { %2201 = vmatprep.subr.bf16.mxu1 %v2535_v1 }
 0x17e   :  { %2203 = vmatpush3.bf16.msra.mxu1 %v2710_v44 }
 0x17f   :  { %2204 = vmatprep.subr.bf16.mxu1 %v2535_v1 }
 0x181   :  { %1826 = vmatmul.mubr.f32.vlgmr.msra.gmra.mrb[0].mxu1 %v231_v4 }
 0x182   :  { %2206 = vmatpush3.bf16.msra.mxu1 %v2965_v19  ;;  %1860 = vmatprep.mubr.msk.f32.mxu1 %vm2534_vm0, %v2533_v0 }
 0x183   :  { %2207 = vmatprep.subr.bf16.mxu1 %v2535_v1 }
 0x186   :  { %2209 = vmatpush3.bf16.msra.mxu1 %v2975_v3 }
 0x187   :  { %2210 = vmatprep.subr.bf16.mxu1 %v2535_v1 }
 0x18a   :  { %2212 = vmatpush3.bf16.msra.mxu1 %v2985_v40 }
 0x18b   :  { %2213 = vmatprep.subr.bf16.mxu1 %v2535_v1 }
 0x18e   :  { %2215 = vmatpush3.bf16.msra.mxu1 %v2993_v41 }
 0x18f   :  { %2216 = vmatprep.subr.bf16.mxu1 %v2535_v1 }
 0x192   :  { %2218 = vmatpush3.bf16.msra.mxu1 %v3001_v42 }
 0x193   :  { %2219 = vmatprep.subr.bf16.mxu1 %v2535_v1 }
 0x196   :  { %2221 = vmatpush3.bf16.msra.mxu1 %v3009_v43 }
 0x197   :  { %2222 = vmatprep.subr.bf16.mxu1 %v2535_v1 }
 0x19a   :  { %2224 = vmatpush3.bf16.msra.mxu1 %v3017_v49 }
 0x19b   :  { %2225 = vmatprep.subr.bf16.mxu1 %v2535_v1 }
 0x19e   :  { %2227 = vmatpush3.bf16.msra.mxu1 %v3025_v46 }
 0x19f   :  { %2228 = vmatprep.subr.bf16.mxu1 %v2535_v1 }
 0x1a1   :  { %1861 = vmatmul.mubr.f32.vlgmr.msra.gmra.mrb[0].mxu1 %v2816_v61 }
 0x1a2   :  { %2230 = vmatpush3.bf16.msra.mxu1 %v2635_v14  ;;  %1895 = vmatprep.mubr.msk.f32.mxu1 %vm2534_vm0, %v2533_v0 }
 0x1a3   :  { %2231 = vmatprep.subr.bf16.mxu1 %v2535_v1 }
 0x1a6   :  { %2233 = vmatpush3.bf16.msra.mxu1 %v2642_v16 }
 0x1a7   :  { %2234 = vmatprep.subr.bf16.mxu1 %v2535_v1 }
 0x1aa   :  { %2236 = vmatpush3.bf16.msra.mxu1 %v2660_v21 }
 0x1ab   :  { %2237 = vmatprep.subr.bf16.mxu1 %v2535_v1 }
 0x1ae   :  { %2239 = vmatpush3.bf16.msra.mxu1 %v2676_v26 }
 0x1af   :  { %2240 = vmatprep.subr.bf16.mxu1 %v2535_v1 }
 0x1b2   :  { %2242 = vmatpush3.bf16.msra.mxu1 %v2688_v29 }
 0x1b3   :  { %2243 = vmatprep.subr.bf16.mxu1 %v2535_v1 }
 0x1b6   :  { %2245 = vmatpush3.bf16.msra.mxu1 %v2698_v34 }
 0x1b7   :  { %2246 = vmatprep.subr.bf16.mxu1 %v2535_v1 }
 0x1ba   :  { %2248 = vmatpush3.bf16.msra.mxu1 %v2704_v39 }
 0x1bb   :  { %2249 = vmatprep.subr.bf16.mxu1 %v2535_v1 }
 0x1be   :  { %2251 = vmatpush3.bf16.msra.mxu1 %v2710_v44 }
 0x1c1   :  { %1896 = vmatmul.mubr.f32.vlgmr.msra.gmra.mrb[0].mxu1 %v2816_v61 }
 0x294   :  { %v785_v47 = vpop.f32.mrb[0].mxu1 }
 0x295   :  { %v3050_v48 = vsub.f32 %v2802_v10, %v785_v47  ;;  %v1897_v51 = vpop.f32.mrb[1].mxu1 }
 0x297   :  { %v790_v52 = vmul.f32 %v3050_v48, %v3050_v48 }
 0x299   :  { %v3054_v55 = vand.u32 4294901760, %v790_v52 }
 0x29b   :  { %v873_v56 = vsub.f32 %v790_v52, %v3054_v55 }
 0x29d   :  { %v874_v59 = vand.u32 4294901760, %v873_v56 }
 0x29f   :  { %v875_v60 = vsub.f32 %v873_v56, %v874_v59 }
 0x2a1   :  { %v876_v63 = vand.u32 4294901760, %v875_v60 }
 0x2a3   :  { %1931 = vmatmul.mubr.f32.vlgmr.msra.gmra.mrb[4].mxu0 %v876_v63 }
 0x2a4   :  { %2278 = vmatpush3.bf16.msra.mxu0 %v2841_v5  ;;  %1965 = vmatprep.mubr.msk.f32.mxu0 %vm2534_vm0, %v2533_v0 }
 0x2a5   :  { %2279 = vmatprep.subr.bf16.mxu0 %v2535_v1 }
 0x2a8   :  { %2281 = vmatpush3.bf16.msra.mxu0 %v2864_v15 }
 0x2a9   :  { %2282 = vmatprep.subr.bf16.mxu0 %v2535_v1 }
 0x2ac   :  { %2284 = vmatpush3.bf16.msra.mxu0 %v2878_v28 }
 0x2ad   :  { %2285 = vmatprep.subr.bf16.mxu0 %v2535_v1 }
 0x2b0   :  { %2287 = vmatpush3.bf16.msra.mxu0 %v2889_v22 }
 0x2b1   :  { %2288 = vmatprep.subr.bf16.mxu0 %v2535_v1 }
 0x2b4   :  { %2290 = vmatpush3.bf16.msra.mxu0 %v2893_v2 }
 0x2b5   :  { %2291 = vmatprep.subr.bf16.mxu0 %v2535_v1 }
 0x2b8   :  { %2293 = vmatpush3.bf16.msra.mxu0 %v2734_v57 }
 0x2b9   :  { %2294 = vmatprep.subr.bf16.mxu0 %v2535_v1 }
 0x2bc   :  { %2296 = vmatpush3.bf16.msra.mxu0 %v2754_v31 }
 0x2bd   :  { %2297 = vmatprep.subr.bf16.mxu0 %v2535_v1 }
 0x2c0   :  { %2299 = vmatpush3.bf16.msra.mxu0 %v2756_v35 }
 0x2c1   :  { %2300 = vmatprep.subr.bf16.mxu0 %v2535_v1 }
 0x2c3   :  { %1966 = vmatmul.mubr.f32.vlgmr.msra.gmra.mrb[4].mxu0 %v3054_v55 }
 0x2c4   :  { %2302 = vmatpush3.bf16.msra.mxu0 %v2905_v13  ;;  %2000 = vmatprep.mubr.msk.f32.mxu0 %vm2534_vm0, %v2533_v0 }
 0x2c5   :  { %2303 = vmatprep.subr.bf16.mxu0 %v2535_v1 }
 0x2c8   :  { %2305 = vmatpush3.bf16.msra.mxu0 %v2912_v24 }
 0x2c9   :  { %2306 = vmatprep.subr.bf16.mxu0 %v2535_v1 }
 0x2cc   :  { %2308 = vmatpush3.bf16.msra.mxu0 %v2920_v6 }
 0x2cd   :  { %2309 = vmatprep.subr.bf16.mxu0 %v2535_v1 }
 0x2d0   :  { %2311 = vmatpush3.bf16.msra.mxu0 %v2926_v7 }
 0x2d1   :  { %2312 = vmatprep.subr.bf16.mxu0 %v2535_v1 }
 0x2d4   :  { %2314 = vmatpush3.bf16.msra.mxu0 %v2932_v53 }
 0x2d5   :  { %2315 = vmatprep.subr.bf16.mxu0 %v2535_v1 }
 0x2d8   :  { %2317 = vmatpush3.bf16.msra.mxu0 %v2760_v36 }
 0x2d9   :  { %2318 = vmatprep.subr.bf16.mxu0 %v2535_v1 }
 0x2dc   :  { %2320 = vmatpush3.bf16.msra.mxu0 %v2764_v37 }
 0x2dd   :  { %2321 = vmatprep.subr.bf16.mxu0 %v2535_v1 }
 0x2e0   :  { %2323 = vmatpush3.bf16.msra.mxu0 %v2768_v38 }
 0x2e1   :  { %2324 = vmatprep.subr.bf16.mxu0 %v2535_v1 }
 0x2e3   :  { %2001 = vmatmul.mubr.f32.vlgmr.msra.gmra.mrb[4].mxu0 %v873_v56 }
 0x2e4   :  { %2326 = vmatpush3.bf16.msra.mxu0 %v2635_v14  ;;  %2035 = vmatprep.mubr.msk.f32.mxu0 %vm2534_vm0, %v2533_v0 }
 0x2e5   :  { %2327 = vmatprep.subr.bf16.mxu0 %v2535_v1 }
 0x2e8   :  { %2329 = vmatpush3.bf16.msra.mxu0 %v2642_v16 }
 0x2e9   :  { %2330 = vmatprep.subr.bf16.mxu0 %v2535_v1 }
 0x2ec   :  { %2332 = vmatpush3.bf16.msra.mxu0 %v2660_v21 }
 0x2ed   :  { %2333 = vmatprep.subr.bf16.mxu0 %v2535_v1 }
 0x2f0   :  { %2335 = vmatpush3.bf16.msra.mxu0 %v2676_v26 }
 0x2f1   :  { %2336 = vmatprep.subr.bf16.mxu0 %v2535_v1 }
 0x2f4   :  { %2338 = vmatpush3.bf16.msra.mxu0 %v2688_v29 }
 0x2f5   :  { %2339 = vmatprep.subr.bf16.mxu0 %v2535_v1 }
 0x2f8   :  { %2341 = vmatpush3.bf16.msra.mxu0 %v2698_v34 }
 0x2f9   :  { %2342 = vmatprep.subr.bf16.mxu0 %v2535_v1 }
 0x2fc   :  { %2344 = vmatpush3.bf16.msra.mxu0 %v2704_v39 }
 0x2fd   :  { %2345 = vmatprep.subr.bf16.mxu0 %v2535_v1 }
 0x300   :  { %2347 = vmatpush3.bf16.msra.mxu0 %v2710_v44 }
 0x301   :  { %2348 = vmatprep.subr.bf16.mxu0 %v2535_v1 }
 0x303   :  { %2036 = vmatmul.mubr.f32.vlgmr.msra.gmra.mrb[4].mxu0 %v874_v59 }
 0x304   :  { %2350 = vmatpush3.bf16.msra.mxu0 %v2965_v19  ;;  %2070 = vmatprep.mubr.msk.f32.mxu0 %vm2534_vm0, %v2533_v0 }
 0x305   :  { %2351 = vmatprep.subr.bf16.mxu0 %v2535_v1 }
 0x308   :  { %2353 = vmatpush3.bf16.msra.mxu0 %v2975_v3 }
 0x309   :  { %2354 = vmatprep.subr.bf16.mxu0 %v2535_v1 }
 0x30c   :  { %2356 = vmatpush3.bf16.msra.mxu0 %v2985_v40 }
 0x30d   :  { %2357 = vmatprep.subr.bf16.mxu0 %v2535_v1 }
 0x310   :  { %2359 = vmatpush3.bf16.msra.mxu0 %v2993_v41 }
 0x311   :  { %2360 = vmatprep.subr.bf16.mxu0 %v2535_v1 }
 0x314   :  { %2362 = vmatpush3.bf16.msra.mxu0 %v3001_v42 }
 0x315   :  { %2363 = vmatprep.subr.bf16.mxu0 %v2535_v1 }
 0x318   :  { %2365 = vmatpush3.bf16.msra.mxu0 %v3009_v43 }
 0x319   :  { %2366 = vmatprep.subr.bf16.mxu0 %v2535_v1 }
 0x31c   :  { %2368 = vmatpush3.bf16.msra.mxu0 %v3017_v49 }
 0x31d   :  { %2369 = vmatprep.subr.bf16.mxu0 %v2535_v1 }
 0x320   :  { %2371 = vmatpush3.bf16.msra.mxu0 %v3025_v46 }
 0x321   :  { %2372 = vmatprep.subr.bf16.mxu0 %v2535_v1 }
 0x323   :  { %2071 = vmatmul.mubr.f32.vlgmr.msra.gmra.mrb[4].mxu0 %v3054_v55 }
 0x324   :  { %2374 = vmatpush3.bf16.msra.mxu0 %v2635_v14  ;;  %2105 = vmatprep.mubr.msk.f32.mxu0 %vm2534_vm0, %v2533_v0 }
 0x325   :  { %2375 = vmatprep.subr.bf16.mxu0 %v2535_v1 }
 0x328   :  { %2377 = vmatpush3.bf16.msra.mxu0 %v2642_v16 }
 0x329   :  { %2378 = vmatprep.subr.bf16.mxu0 %v2535_v1 }
 0x32c   :  { %2380 = vmatpush3.bf16.msra.mxu0 %v2660_v21 }
 0x32d   :  { %2381 = vmatprep.subr.bf16.mxu0 %v2535_v1 }
 0x330   :  { %2383 = vmatpush3.bf16.msra.mxu0 %v2676_v26  ;;  %v1471_v26 = vld [vmem:[%s3171_s3] ss:$0 sm:$0xff] }
 0x331   :  { %2384 = vmatprep.subr.bf16.mxu0 %v2535_v1 }
 0x334   :  { %2386 = vmatpush3.bf16.msra.mxu0 %v2688_v29 }
 0x335   :  { %2387 = vmatprep.subr.bf16.mxu0 %v2535_v1 }
 0x338   :  { %2389 = vmatpush3.bf16.msra.mxu0 %v2698_v34  ;;  %v1472_v34 = vld [vmem:[%s3172_s4] ss:$0 sm:$0xff] }
 0x339   :  { %2390 = vmatprep.subr.bf16.mxu0 %v2535_v1 }
 0x33c   :  { %2392 = vmatpush3.bf16.msra.mxu0 %v2704_v39 }
 0x33d   :  { %2393 = vmatprep.subr.bf16.mxu0 %v2535_v1 }
 0x340   :  { %2395 = vmatpush3.bf16.msra.mxu0 %v2710_v44 }
 0x343   :  { %2106 = vmatmul.mubr.f32.vlgmr.msra.gmra.mrb[4].mxu0 %v3054_v55 }
 0x416   :  { %v1428_v0 = vpop.f32.mrb[4].mxu0 }
 0x417   :  { %v2396_v14 = vadd.f32 1e-05, %v1428_v0  ;;  %v2107_v16 = vpop.f32.mrb[5].mxu0 }
 0x419   :  { %2430 = vrsqrt.f32 %v2396_v14 }
 0x423   :  { %v2431_v21 = vpop.eup %2430 }
 0x424   :  { %v1433_v29 = vmul.f32 %v2431_v21, %v3050_v48 }
 0x426   :  { %v1441_v1 = vmul.f32 %v1471_v26, %v1433_v29 }
 0x428   :  { %v1449_v39 = vadd.f32 %v1472_v34, %v1441_v1 }
 0x42a   :  { %1450 = vst [vmem:[#allocation8] sm:$0xff] %v1449_v39 }
 0x42b   :  { %2509 = shalt.err (!%p2506_p0)
}
 0x42c   :  { %s2510_s19 = scalar_lea.hbm %s3174_s6, 128 }
 0x42d   :  { %p2511_p1 = scmp.ne.s32.totalorder %s3174_s6, %s2510_s19  ;;  %p2514_p2 = scmp.lt.u32.totalorder %s2510_s19, %s3174_s6 }
 0x42f   :  { %p2516_p3 = pnand %p2514_p2, %p2511_p1 }
 0x431   :  { %2519 = shalt.err (!%p2516_p3)
}
 0x432   :  { %1460 = dma.vmem_to_hbm [thread:$0]  %s1458_s16, 128, %s3174_s6, [#allocation4]  }
 0x433   :  { %2524 = dma.done.wait [#allocation4], 128  }
 0x434   :  { %2525 = vsyncadd [#allocation4], 4294967168 }
 0x435   :  { %1464 = vsyncpa [#allocation3], 1 }
 0x436   :  { %1465 = vsyncpa [#allocation6], 1 }
 0x437   :  { %1466 = vsyncpa [#allocation4], 1 }

</bundles_post_ra>
